<compile_context>
chip_gen: v6e
topology: v6e:2x2x1
jax: 0.10.0
libtpu: 0.0.40
codegen_flags: <defaults>
</compile_context>

<pallas_src>
import numpy as np
import jax
import jax.numpy as jnp
from jax.experimental import pallas as pl
from jax.experimental.pallas import tpu as pltpu

EPS = 1e-6
_HIGHEST = jax.lax.Precision.HIGHEST


# ----------------------------------------------------------------------------
# shared math helpers
# ----------------------------------------------------------------------------
def _erf(x):
    # Abramowitz & Stegun 7.1.26 rational approximation (reference path only).
    a1, a2, a3, a4, a5 = 0.254829592, -0.284496736, 1.421413741, -1.453152027, 1.061405429
    p = 0.3275911
    sgn = jnp.where(x >= 0.0, 1.0, -1.0)
    ax = jnp.abs(x)
    t = 1.0 / (1.0 + p * ax)
    poly = ((((a5 * t + a4) * t + a3) * t + a2) * t + a1) * t
    return sgn * (1.0 - poly * jnp.exp(-ax * ax))


def _gelu_exact(x):
    # erf-based GELU (matches torch.nn.GELU() default); used in the reference.
    return 0.5 * x * (1.0 + _erf(x * 0.7071067811865476))


def _gelu_tanh(x):
    # tanh-approximate GELU: the transcendental lands on the EUP slot.
    return 0.5 * x * (1.0 + jnp.tanh(0.7978845608028654 * (x + 0.044715 * x * x * x)))


def _ln(x, g, b):
    mu = jnp.mean(x, axis=-1, keepdims=True)
    xc = x - mu
    var = jnp.mean(xc * xc, axis=-1, keepdims=True)
    return xc * jax.lax.rsqrt(var + EPS) * g + b


# ----------------------------------------------------------------------------
# tiling helpers
# ----------------------------------------------------------------------------
def _round_up(v, m):
    return -(-v // m) * m


def _pick_row_tile(m, target):
    """Largest tile <= target that divides m and is a multiple of 8 (or m)."""
    if m <= target:
        return m
    t = (target // 8) * 8
    while t >= 8:
        if m % t == 0:
            return t
        t -= 8
    return m


def _pick_h_tile(h, cap=16):
    """Largest divisor of h that is <= cap and >= 3 (halo needs 3 rows), or h."""
    if h <= cap:
        return h
    for t in range(min(h, cap), 2, -1):
        if h % t == 0:
            return t
    return h  # no usable divisor: single tile (may exceed cap; loud fallback)


# ----------------------------------------------------------------------------
# Pallas kernels
# ----------------------------------------------------------------------------
def _make_block_kernel(th, W, Wp, C, fuse_ln):
    """Fused ConvNeXt block over one (batch, row-tile) grid step.

    The unpadded activation stays in HBM (pl.ANY); the kernel DMAs the halo'd
    row slab into VMEM scratch, zero-fills the out-of-image halo, runs the
    7x7 depthwise conv, then LN + pwconv1 + GELU + pwconv2 + residual as one
    token-flat MXU matmul (optionally followed by the next downsample stage's
    LayerNorm)."""
    pad_r = Wp + 6 - (3 + W)   # right zero-border width inside the slab (>= 3)

    def kernel(*refs):
        if fuse_ln:
            (x_hbm, wf_ref, db_ref, g_ref, beta_ref, w1_ref, b1_ref, w2_ref,
             b2_ref, g2_ref, beta2_ref, o_ref, slab_ref, sem_ref) = refs
        else:
            (x_hbm, wf_ref, db_ref, g_ref, beta_ref, w1_ref, b1_ref, w2_ref,
             b2_ref, o_ref, slab_ref, sem_ref) = refs

        b = pl.program_id(0)
        h = pl.program_id(1)
        nh = pl.num_programs(1)
        r0 = h * th
        if th % 8 == 0:
            r0 = pl.multiple_of(r0, 8)

        # ---- assemble the zero-padded halo slab in VMEM (no HBM pad round trip)
        center = pltpu.make_async_copy(
            x_hbm.at[b, pl.ds(r0, th), :, :],
            slab_ref.at[pl.ds(3, th), pl.ds(3, W), :],
            sem_ref.at[0])
        center.start()

        @pl.when(h > 0)
        def _():
            cp = pltpu.make_async_copy(
                x_hbm.at[b, pl.ds(r0 - 3, 3), :, :],
                slab_ref.at[pl.ds(0, 3), pl.ds(3, W), :],
                sem_ref.at[1])
            cp.start()
            cp.wait()

        @pl.when(h == 0)
        def _():
            slab_ref[0:3, 3:3 + W, :] = jnp.zeros((3, W, C), jnp.float32)

        @pl.when(h < nh - 1)
        def _():
            cp = pltpu.make_async_copy(
                x_hbm.at[b, pl.ds(r0 + th, 3), :, :],
                slab_ref.at[pl.ds(3 + th, 3), pl.ds(3, W), :],
                sem_ref.at[2])
            cp.start()
            cp.wait()

        @pl.when(h == nh - 1)
        def _():
            slab_ref[3 + th:6 + th, 3:3 + W, :] = jnp.zeros((3, W, C), jnp.float32)

        # left/right column halos (and the Wp-W alignment pad) are always zero
        slab_ref[:, 0:3, :] = jnp.zeros((th + 6, 3, C), jnp.float32)
        slab_ref[:, 3 + W:, :] = jnp.zeros((th + 6, pad_r, C), jnp.float32)

        center.wait()

        # ---- 7x7 depthwise conv: hoist the column (sublane) shift to the
        #      outer loop -> 7 shifted slab loads, 49 cheap row-sliced FMAs.
        wf = wf_ref[...]                               # (49, C) f32
        acc = jnp.zeros((th, Wp, C), jnp.float32)
        shortcut = None
        for dx in range(7):
            xs_dx = slab_ref[:, dx:dx + Wp, :]         # (th+6, Wp, C)
            if dx == 3:
                shortcut = xs_dx[3:3 + th]             # original input tile
            for dy in range(7):
                acc = acc + xs_dx[dy:dy + th] * wf[dy * 7 + dx]
        acc = acc + db_ref[0, :]

        # ---- LN + pwconv1 + GELU + pwconv2 + residual: one token-flat matmul
        t = th * Wp
        tok = acc.reshape(t, C)
        z = _ln(tok, g_ref[0, :], beta_ref[0, :])
        z = jnp.dot(z.astype(jnp.bfloat16), w1_ref[...],
                    preferred_element_type=jnp.float32) + b1_ref[0, :]
        z = _gelu_tanh(z)
        z = jnp.dot(z.astype(jnp.bfloat16), w2_ref[...],
                    preferred_element_type=jnp.float32) + b2_ref[0, :]
        out = z + shortcut.reshape(t, C)
        if fuse_ln:
            out = _ln(out, g2_ref[0, :], beta2_ref[0, :])
        out = out.reshape(th, Wp, C)
        o_ref[...] = out[:, :W, :].reshape(1, th, W, C)

    return kernel


def _make_patch_kernel(fuse_ln):
    """Strided patch conv as a token-tiled matmul, optional LN epilogue (stem)."""
    def kernel(x_ref, w_ref, b_ref, *rest):
        if fuse_ln:
            g_ref, beta_ref, o_ref = rest
        else:
            (o_ref,) = rest
        acc = jnp.dot(x_ref[...].astype(jnp.bfloat16), w_ref[...],
                      preferred_element_type=jnp.float32) + b_ref[0, :]
        if fuse_ln:
            acc = _ln(acc, g_ref[0, :], beta_ref[0, :])
        o_ref[...] = acc
    return kernel


def _ln_kernel(x_ref, g_ref, b_ref, o_ref):
    o_ref[...] = _ln(x_ref[...], g_ref[0, :], b_ref[0, :])


def _head_kernel(x_ref, g_ref, b_ref, w_ref, fb_ref, o_ref):
    # fused: global average pool -> LayerNorm -> Linear (tiny; keep f32/HIGHEST)
    pooled = jnp.mean(x_ref[...], axis=1)                # (B, C)
    h = _ln(pooled, g_ref[0, :], b_ref[0, :])
    o_ref[...] = jnp.dot(h, w_ref[...], preferred_element_type=jnp.float32,
                         precision=_HIGHEST) + fb_ref[0, :]


# ----------------------------------------------------------------------------
# wrappers around pallas_call
# ----------------------------------------------------------------------------
def convnext_block(x, blk, ds_ln=None):
    """x: (B,H,W,C) f32. ds_ln: optional (gamma, beta) of the *next* downsample
    stage's LayerNorm, fused as an epilogue (applied after the residual add)."""
    B, H, W, C = x.shape
    C4 = blk["w1"].shape[1]
    th = _pick_h_tile(H, 16)
    Wp = _round_up(W, 8)
    fuse = ds_ln is not None

    wf = blk["dw_w"].reshape(49, C)

    in_specs = [
        pl.BlockSpec(memory_space=pl.ANY),               # activation stays in HBM
        pl.BlockSpec((49, C), lambda b, h: (0, 0)),
        pl.BlockSpec((1, C), lambda b, h: (0, 0)),
        pl.BlockSpec((1, C), lambda b, h: (0, 0)),
        pl.BlockSpec((1, C), lambda b, h: (0, 0)),
        pl.BlockSpec((C, C4), lambda b, h: (0, 0)),
        pl.BlockSpec((1, C4), lambda b, h: (0, 0)),
        pl.BlockSpec((C4, C), lambda b, h: (0, 0)),
        pl.BlockSpec((1, C), lambda b, h: (0, 0)),
    ]
    args = [x, wf, blk["dw_b"].reshape(1, C),
            blk["ln_g"].reshape(1, C), blk["ln_b"].reshape(1, C),
            blk["w1"].astype(jnp.bfloat16), blk["b1"].reshape(1, C4),
            blk["w2"].astype(jnp.bfloat16), blk["b2"].reshape(1, C)]
    if fuse:
        g2, b2 = ds_ln
        in_specs += [pl.BlockSpec((1, C), lambda b, h: (0, 0)),
                     pl.BlockSpec((1, C), lambda b, h: (0, 0))]
        args += [g2.reshape(1, C), b2.reshape(1, C)]

    return pl.pallas_call(
        _make_block_kernel(th, W, Wp, C, fuse),
        out_shape=jax.ShapeDtypeStruct((B, H, W, C), jnp.float32),
        grid=(B, H // th),
        in_specs=in_specs,
        out_specs=pl.BlockSpec((1, th, W, C), lambda b, h: (b, h, 0, 0)),
        scratch_shapes=[pltpu.VMEM((th + 6, Wp + 6, C), jnp.float32),
                        pltpu.SemaphoreType.DMA((3,))],
        compiler_params=pltpu.CompilerParams(
            dimension_semantics=("parallel", "parallel"),
            vmem_limit_bytes=40 * 1024 * 1024),
    )(*args)


def patch_conv(x, w, b, k, ln=None, tile_m=256):
    """Strided kxk conv (stride=k) as patchify + token-tiled Pallas matmul.
    `ln`: optional (gamma, beta) fused as an epilogue (stem LayerNorm)."""
    B, H, W, Cin = x.shape
    Ho, Wo = H // k, W // k
    Cout = w.shape[-1]
    Kd = k * k * Cin
    # TODO(synk): fold the patchify gather into the kernel/index_map instead of
    # materializing xp in HBM.
    xp = (x.reshape(B, Ho, k, Wo, k, Cin)
            .transpose(0, 1, 3, 2, 4, 5)
            .reshape(B * Ho * Wo, Kd))
    wf = w.reshape(Kd, Cout).astype(jnp.bfloat16)
    M = B * Ho * Wo
    tm = _pick_row_tile(M, tile_m)
    fuse = ln is not None

    in_specs = [
        pl.BlockSpec((tm, Kd), lambda i: (i, 0)),
        pl.BlockSpec((Kd, Cout), lambda i: (0, 0)),
        pl.BlockSpec((1, Cout), lambda i: (0, 0)),
    ]
    args = [xp, wf, b.reshape(1, Cout)]
    if fuse:
        g, beta = ln
        in_specs += [pl.BlockSpec((1, Cout), lambda i: (0, 0)),
                     pl.BlockSpec((1, Cout), lambda i: (0, 0))]
        args += [g.reshape(1, Cout), beta.reshape(1, Cout)]

    out = pl.pallas_call(
        _make_patch_kernel(fuse),
        out_shape=jax.ShapeDtypeStruct((M, Cout), jnp.float32),
        grid=(M // tm,),
        in_specs=in_specs,
        out_specs=pl.BlockSpec((tm, Cout), lambda i: (i, 0)),
        compiler_params=pltpu.CompilerParams(dimension_semantics=("parallel",)),
    )(*args)
    return out.reshape(B, Ho, Wo, Cout)


def layernorm_tokens(x, g, b, tile_m=512):
    """Token-tiled standalone LayerNorm (only used as a degenerate fallback)."""
    M, C = x.shape
    tm = _pick_row_tile(M, tile_m)
    return pl.pallas_call(
        _ln_kernel,
        out_shape=jax.ShapeDtypeStruct((M, C), jnp.float32),
        grid=(M // tm,),
        in_specs=[pl.BlockSpec((tm, C), lambda i: (i, 0)),
                  pl.BlockSpec((1, C), lambda i: (0, 0)),
                  pl.BlockSpec((1, C), lambda i: (0, 0))],
        out_specs=pl.BlockSpec((tm, C), lambda i: (i, 0)),
        compiler_params=pltpu.CompilerParams(dimension_semantics=("parallel",)),
    )(x, g.reshape(1, C), b.reshape(1, C))


def head(x_tokens, g, b, fc_w, fc_b):
    B, _, C = x_tokens.shape
    N = fc_w.shape[1]
    vm = pl.BlockSpec(memory_space=pltpu.MemorySpace.VMEM)
    return pl.pallas_call(
        _head_kernel,
        out_shape=jax.ShapeDtypeStruct((B, N), jnp.float32),
        in_specs=[vm] * 5,
        out_specs=vm,
    )(x_tokens, g.reshape(1, C), b.reshape(1, C), fc_w, fc_b.reshape(1, N))


# ----------------------------------------------------------------------------
# model: parameters + forward
# ----------------------------------------------------------------------------
def init_params(key, in_ch, layers, dims, num_classes):
    keys = iter(jax.random.split(key, 512))

    def nrm(shape, scale=0.02):
        return scale * jax.random.normal(next(keys), shape, jnp.float32)

    down = [dict(w=nrm((4, 4, in_ch, dims[0])), b=nrm((dims[0],)),
                 ln_g=1.0 + nrm((dims[0],)), ln_b=nrm((dims[0],)))]
    for i in range(1, 4):
        down.append(dict(ln_g=1.0 + nrm((dims[i - 1],)), ln_b=nrm((dims[i - 1],)),
                         w=nrm((2, 2, dims[i - 1], dims[i])), b=nrm((dims[i],))))

    stages = []
    for i in range(4):
        C = dims[i]
        blocks = []
        for _ in range(layers[i]):
            blocks.append(dict(dw_w=nrm((7, 7, C)), dw_b=nrm((C,)),
                               ln_g=1.0 + nrm((C,)), ln_b=nrm((C,)),
                               w1=nrm((C, 4 * C)), b1=nrm((4 * C,)),
                               w2=nrm((4 * C, C)), b2=nrm((C,))))
        stages.append(blocks)

    return dict(down=down, stages=stages,
                norm_g=1.0 + nrm((dims[-1],)), norm_b=nrm((dims[-1],)),
                fc_w=nrm((dims[-1], num_classes)), fc_b=nrm((num_classes,)))


def convnext_forward(params, x_nchw):
    x = jnp.transpose(x_nchw, (0, 2, 3, 1)).astype(jnp.float32)   # NCHW -> NHWC
    for i in range(4):
        p = params["down"][i]
        if i == 0:
            # stem conv with its channels_first LayerNorm fused as an epilogue
            x = patch_conv(x, p["w"], p["b"], 4, ln=(p["ln_g"], p["ln_b"]))
        else:
            # the pre-downsample LN was already applied by the previous stage's
            # last fused block kernel
            x = patch_conv(x, p["w"], p["b"], 2, ln=None)

        blocks = params["stages"][i]
        ds_ln = None
        if i < 3:
            q = params["down"][i + 1]
            ds_ln = (q["ln_g"], q["ln_b"])
        for j, blk in enumerate(blocks):
            fuse = ds_ln if j == len(blocks) - 1 else None
            x = convnext_block(x, blk, fuse)
        if not blocks and ds_ln is not None:   # degenerate empty-stage fallback
            B, H, W, C = x.shape
            x = layernorm_tokens(x.reshape(-1, C), *ds_ln).reshape(B, H, W, C)

    B, H, W, C = x.shape
    return head(x.reshape(B, H * W, C),
                params["norm_g"], params["norm_b"],
                params["fc_w"], params["fc_b"])


# ----------------------------------------------------------------------------
# pure-JAX reference (lax.conv based, f32/HIGHEST) for the correctness check
# ----------------------------------------------------------------------------
def ref_forward(params, x_nchw):
    x = jnp.transpose(x_nchw, (0, 2, 3, 1)).astype(jnp.float32)

    def conv(v, w, b, stride, pad, groups=1):
        return jax.lax.conv_general_dilated(
            v, w, (stride, stride), pad,
            dimension_numbers=("NHWC", "HWIO", "NHWC"),
            feature_group_count=groups, precision=_HIGHEST) + b

    for i in range(4):
        p = params["down"][i]
        if i == 0:
            x = conv(x, p["w"], p["b"], 4, "VALID")
            x = _ln(x, p["ln_g"], p["ln_b"])
        else:
            x = _ln(x, p["ln_g"], p["ln_b"])
            x = conv(x, p["w"], p["b"], 2, "VALID")
        for blk in params["stages"][i]:
            C = x.shape[-1]
            y = conv(x, blk["dw_w"].reshape(7, 7, 1, C), blk["dw_b"], 1,
                     ((3, 3), (3, 3)), groups=C)
            h = _ln(y, blk["ln_g"], blk["ln_b"])
            h = _gelu_exact(jnp.einsum("bhwc,cd->bhwd", h, blk["w1"],
                                       precision=_HIGHEST) + blk["b1"])
            h = jnp.einsum("bhwd,dc->bhwc", h, blk["w2"], precision=_HIGHEST) + blk["b2"]
            x = x + h
    x = jnp.mean(x, axis=(1, 2))
    x = _ln(x, params["norm_g"], params["norm_b"])
    return jnp.dot(x, params["fc_w"], precision=_HIGHEST) + params["fc_b"]


# ----------------------------------------------------------------------------
if __name__ == "__main__":
    key = jax.random.PRNGKey(0)
    k_params, k_input = jax.random.split(key)

    # small synthetic config consistent with the module's constructor
    in_ch, layers, dims, num_classes = 3, [1, 1, 2, 1], [16, 32, 64, 128], 32
    params = init_params(k_params, in_ch, layers, dims, num_classes)

    # 128x128 input -> stage-1 feature map 32x32, so the halo'd multi-row-tile
    # DMA path (top/bottom halo copies + boundary zero-fill) is exercised.
    x = jax.random.normal(k_input, (2, in_ch, 128, 128), jnp.float32)   # NCHW

    out = convnext_forward(params, x)
    out = jax.block_until_ready(out)
    assert out.shape == (2, num_classes), out.shape

    ref = jax.block_until_ready(ref_forward(params, x))
    # kernel uses bf16 MXU matmuls (f32 accumulate) + tanh-GELU; reference is
    # f32/HIGHEST with erf-GELU
    np.testing.assert_allclose(np.asarray(out), np.asarray(ref), rtol=2e-2, atol=2e-2)

    print("KERNEL_OK")
</pallas_src>

<mosaic_0001>
module attributes {stable_mosaic.version = 11 : i64} {
  func.func @kernel(%arg0: i32, %arg1: memref<256x48xf32, #tpu.memory_space<vmem>>, %arg2: memref<48x16xbf16, #tpu.memory_space<vmem>>, %arg3: memref<1x16xf32, #tpu.memory_space<vmem>>, %arg4: memref<1x16xf32, #tpu.memory_space<vmem>>, %arg5: memref<1x16xf32, #tpu.memory_space<vmem>>, %arg6: memref<256x16xf32, #tpu.memory_space<vmem>>) attributes {dimension_semantics = [#tpu.dimension_semantics<parallel>], iteration_bounds = array<i64: 8>, scalar_prefetch = 0 : i64, scratch_operands = 0 : i64, tpu.core_type = #tpu.core_type<tc>, window_params = [{transform_indices = @transform_0, window_bounds = array<i64: 256, 48>}, {pipeline_mode = #tpu.pipeline_mode<synchronous>, transform_indices = @transform_1, window_bounds = array<i64: 48, 16>}, {pipeline_mode = #tpu.pipeline_mode<synchronous>, transform_indices = @transform_2, window_bounds = array<i64: 1, 16>}, {pipeline_mode = #tpu.pipeline_mode<synchronous>, transform_indices = @transform_3, window_bounds = array<i64: 1, 16>}, {pipeline_mode = #tpu.pipeline_mode<synchronous>, transform_indices = @transform_4, window_bounds = array<i64: 1, 16>}, {transform_indices = @transform_5, window_bounds = array<i64: 256, 16>}]} {
    %c0 = arith.constant 0 : index
    %c0_0 = arith.constant 0 : index
    %0 = vector.load %arg1[%c0, %c0_0] : memref<256x48xf32, #tpu.memory_space<vmem>>, vector<256x48xf32>
    %1 = arith.truncf %0 : vector<256x48xf32> to vector<256x48xbf16>
    %c0_1 = arith.constant 0 : index
    %c0_2 = arith.constant 0 : index
    %2 = vector.load %arg2[%c0_1, %c0_2] : memref<48x16xbf16, #tpu.memory_space<vmem>>, vector<48x16xbf16>
    %cst = arith.constant dense<0.000000e+00> : vector<256x16xf32>
    %3 = tpu.matmul %1, %2, %cst {dimension_numbers = #tpu.dot_dimension_numbers<[1], [0], [0], [1], [0, 0, 1, 1], [], []>} : vector<256x48xbf16>, vector<48x16xbf16>, vector<256x16xf32> -> vector<256x16xf32>
    %c0_3 = arith.constant 0 : index
    %c0_4 = arith.constant 0 : index
    %4 = vector.load %arg3[%c0_3, %c0_4] : memref<1x16xf32, #tpu.memory_space<vmem>>, vector<1x16xf32>
    %5 = vector.shape_cast %4 : vector<1x16xf32> to vector<16xf32>
    %6 = vector.shape_cast %5 : vector<16xf32> to vector<1x16xf32>
    %7 = vector.broadcast %6 : vector<1x16xf32> to vector<256x16xf32>
    %8 = arith.addf %3, %7 : vector<256x16xf32>
    %c0_5 = arith.constant 0 : index
    %c0_6 = arith.constant 0 : index
    %9 = vector.load %arg4[%c0_5, %c0_6] : memref<1x16xf32, #tpu.memory_space<vmem>>, vector<1x16xf32>
    %10 = vector.shape_cast %9 : vector<1x16xf32> to vector<16xf32>
    %c0_7 = arith.constant 0 : index
    %c0_8 = arith.constant 0 : index
    %11 = vector.load %arg5[%c0_7, %c0_8] : memref<1x16xf32, #tpu.memory_space<vmem>>, vector<1x16xf32>
    %12 = vector.shape_cast %11 : vector<1x16xf32> to vector<16xf32>
    %cst_9 = arith.constant dense<0.000000e+00> : vector<256xf32>
    %13 = vector.multi_reduction <add>, %8, %cst_9 [1] : vector<256x16xf32> to vector<256xf32>
    %14 = vector.shape_cast %13 : vector<256xf32> to vector<256x1xf32>
    %cst_10 = arith.constant 1.600000e+01 : f32
    %15 = vector.broadcast %cst_10 : f32 to vector<256x1xf32>
    %16 = arith.divf %14, %15 : vector<256x1xf32>
    %17 = vector.broadcast %16 : vector<256x1xf32> to vector<256x16xf32>
    %18 = arith.subf %8, %17 : vector<256x16xf32>
    %19 = arith.mulf %18, %18 : vector<256x16xf32>
    %cst_11 = arith.constant dense<0.000000e+00> : vector<256xf32>
    %20 = vector.multi_reduction <add>, %19, %cst_11 [1] : vector<256x16xf32> to vector<256xf32>
    %21 = vector.shape_cast %20 : vector<256xf32> to vector<256x1xf32>
    %cst_12 = arith.constant 1.600000e+01 : f32
    %22 = vector.broadcast %cst_12 : f32 to vector<256x1xf32>
    %23 = arith.divf %21, %22 : vector<256x1xf32>
    %cst_13 = arith.constant 9.99999997E-7 : f32
    %24 = vector.broadcast %cst_13 : f32 to vector<256x1xf32>
    %25 = arith.addf %23, %24 : vector<256x1xf32>
    %26 = math.rsqrt %25 : vector<256x1xf32>
    %27 = vector.broadcast %26 : vector<256x1xf32> to vector<256x16xf32>
    %28 = arith.mulf %18, %27 : vector<256x16xf32>
    %29 = vector.shape_cast %10 : vector<16xf32> to vector<1x16xf32>
    %30 = vector.broadcast %29 : vector<1x16xf32> to vector<256x16xf32>
    %31 = arith.mulf %28, %30 : vector<256x16xf32>
    %32 = vector.shape_cast %12 : vector<16xf32> to vector<1x16xf32>
    %33 = vector.broadcast %32 : vector<1x16xf32> to vector<256x16xf32>
    %34 = arith.addf %31, %33 : vector<256x16xf32>
    %c0_14 = arith.constant 0 : index
    %c0_15 = arith.constant 0 : index
    %35 = vector.load %arg6[%c0_14, %c0_15] : memref<256x16xf32, #tpu.memory_space<vmem>>, vector<256x16xf32>
    tpu.vector_store %arg6[%c0_14, %c0_15], %34 {strides = array<i32>} : memref<256x16xf32, #tpu.memory_space<vmem>>, vector<256x16xf32>,
    return
  }
  func.func @transform_0(%arg0: i32) -> (i32, i32) {
    %c0_i32 = arith.constant 0 : i32
    %c0_i32_0 = arith.constant 0 : i32
    return %arg0, %c0_i32 : i32, i32
  }
  func.func @transform_1(%arg0: i32) -> (i32, i32) {
    %c0_i32 = arith.constant 0 : i32
    %c0_i32_0 = arith.constant 0 : i32
    %c0_i32_1 = arith.constant 0 : i32
    return %c0_i32, %c0_i32_0 : i32, i32
  }
  func.func @transform_2(%arg0: i32) -> (i32, i32) {
    %c0_i32 = arith.constant 0 : i32
    %c0_i32_0 = arith.constant 0 : i32
    %c0_i32_1 = arith.constant 0 : i32
    return %c0_i32, %c0_i32_0 : i32, i32
  }
  func.func @transform_3(%arg0: i32) -> (i32, i32) {
    %c0_i32 = arith.constant 0 : i32
    %c0_i32_0 = arith.constant 0 : i32
    %c0_i32_1 = arith.constant 0 : i32
    return %c0_i32, %c0_i32_0 : i32, i32
  }
  func.func @transform_4(%arg0: i32) -> (i32, i32) {
    %c0_i32 = arith.constant 0 : i32
    %c0_i32_0 = arith.constant 0 : i32
    %c0_i32_1 = arith.constant 0 : i32
    return %c0_i32, %c0_i32_0 : i32, i32
  }
  func.func @transform_5(%arg0: i32) -> (i32, i32) {
    %c0_i32 = arith.constant 0 : i32
    %c0_i32_0 = arith.constant 0 : i32
    return %arg0, %c0_i32 : i32, i32
  }
}

</mosaic_0001>

<bundles_post_ra>
// kernel: tpu_custom_call.1
= control target key start
LH: loop header
LB: loop body
LE: loop exit
PB: predicated region body
PF: predicated region fallthrough
CT: control target
= control target key end

     0   :  { %s1311_s18 = smov 0   ;;  %s1923_s0 = inlined_call_operand.vmem [shape: f32[2048,48], index: 0, kind: input, shape index: {}]   ;;  %s1924_s1 = inlined_call_operand.vmem [shape: bf16[48,16], index: 1, kind: input, shape index: {}]   ;;  %s1925_s2 = inlined_call_operand.vmem [shape: f32[1,16], index: 2, kind: input, shape index: {}]   ;;  %s1926_s3 = inlined_call_operand.vmem [shape: f32[1,16], index: 3, kind: input, shape index: {}]   ;;  %s1927_s4 = inlined_call_operand.vmem [shape: f32[1,16], index: 4, kind: input, shape index: {}]   ;;  %s1928_s5 = inlined_call_operand.vmem [shape: f32[2048,16], index: 5, kind: output, shape index: {}]  }
   0x1 LB: > { %s1102_s19 = sadd.s32 4294967295, %s1279_s18   ;;  %p1106_p0 = scmp.ge.s32.totalorder %s1279_s18, 1  ;;  %s1279_s18 = sphi %s1311_s18, %s15_s18  }
   0x2   : > { %p188_p1 = scmp.lt.s32.totalorder %s1279_s18, 9 }
   0x4   : > { %p189_p2 = pnand %p1106_p0, %p188_p1 }
   0x5   : > { %s1107_s22 = sshll.u32 (!%p189_p2), %s1102_s19, 5 }
   0x6   : > { %192 = sbr.rel (%p189_p2) target bundleno = 592 (0x250), region = 40  ;;  %p217_p3 = scmp.lt.s32.totalorder (!%p189_p2), %s1107_s22, 255 }
   0xb   : > { %v1206_v0 = vld [vmem:[%s1924_s1 + $0x10] sm:$0xff]   ;;  %v1207_v1 = vld [vmem:[%s1924_s1 + $0x8] sm:$0xff]   ;;  %s1930_s22 = smov (!%p217_p3, %s1107_s22), 255  ;;  %v1208_v2 = vld [vmem:[%s1924_s1] sm:$0xff]   ;;  %vm308_vm0 = vcmask 392192   ;;  %vm520_vm1 = vcmask 130048  }
   0xc   : > { %1154 = vmatprep.subr.bf16.mxu0 %v1206_v0  ;;  %1192 = vmatprep.subr.bf16.mxu1 %v1206_v0  ;;  %s1108_s27 = sshll.u32 %s1930_s22, 3  ;;  %v1389_v51 = vld [vmem:[%s1925_s2] ss:$0 sm:$0xff] }
   0xd   : > { %1155 = vmatpush3.bf16.msra.mxu0 %v1206_v0  ;;  %1195 = vmatpush3.bf16.msra.mxu1 %v1206_v0  ;;  %s1336_s30 = scalar_lea.vmem %s1923_s0, %s1108_s27  ;;  %s1760_s14 = scalar_lea.vmem %s1928_s5, %s1108_s27 }
   0xe   : > { %1156 = vmatprep.subr.bf16.mxu0 %v1207_v1  ;;  %1193 = vmatprep.subr.bf16.mxu1 %v1207_v1  ;;  %v229_v3 = vld [vmem:[%s1336_s30] sm:$0xff]  ;;  %v230_v4 = vld [vmem:[%s1336_s30 + $0x8] sm:$0xff]  ;;  %v231_v8 = vld [vmem:[%s1336_s30 + $0x10] sm:$0xff] }
   0xf   : > { %v245_v5 = vld [vmem:[%s1336_s30 + $0x80] sm:$0xff]  ;;  %v261_v6 = vpack.c.bf16 %v230_v4, %v229_v3  ;;  %v246_v7 = vld [vmem:[%s1336_s30 + $0x88] sm:$0xff]  ;;  %v232_v9 = vld [vmem:[%s1336_s30 + $0x18] sm:$0xff] }
  0x10   : > { %v269_v10 = vpack.c.bf16 %v246_v7, %v245_v5  ;;  %v247_v11 = vld [vmem:[%s1336_s30 + $0x90] sm:$0xff]  ;;  %v248_v12 = vld [vmem:[%s1336_s30 + $0x98] sm:$0xff]  ;;  %v233_v13 = vld [vmem:[%s1336_s30 + $0x20] sm:$0xff]  ;;  %v262_v14 = vpack.c.bf16 %v232_v9, %v231_v8 }
  0x11   : > { %1157 = vmatpush3.bf16.msra.mxu0 %v1207_v1  ;;  %1196 = vmatpush3.bf16.msra.mxu1 %v1207_v1  ;;  %v270_v15 = vpack.c.bf16 %v248_v12, %v247_v11  ;;  %v234_v16 = vld [vmem:[%s1336_s30 + $0x28] sm:$0xff]  ;;  %v249_v18 = vld [vmem:[%s1336_s30 + $0xa0] sm:$0xff]  ;;  %v235_v21 = vld [vmem:[%s1336_s30 + $0x30] sm:$0xff] }
  0x12   : > { %1158 = vmatprep.subr.bf16.mxu0 %v1208_v2  ;;  %1194 = vmatprep.subr.bf16.mxu1 %v1208_v2  ;;  %v263_v17 = vpack.c.bf16 %v234_v16, %v233_v13  ;;  %v250_v19 = vld [vmem:[%s1336_s30 + $0xa8] sm:$0xff]  ;;  %v236_v22 = vld [vmem:[%s1336_s30 + $0x38] sm:$0xff]  ;;  %v251_v23 = vld [vmem:[%s1336_s30 + $0xb0] sm:$0xff] }
  0x13   : > { %1160 = vmatprep.mubr.msk.bf16.mxu0 %vm308_vm0, %v261_v6  ;;  %1176 = vmatprep.mubr.msk.bf16.mxu1 %vm308_vm0, %v269_v10  ;;  %v271_v20 = vpack.c.bf16 %v250_v19, %v249_v18  ;;  %v252_v24 = vld [vmem:[%s1336_s30 + $0xb8] sm:$0xff]  ;;  %v237_v25 = vld [vmem:[%s1336_s30 + $0x40] sm:$0xff]  ;;  %v238_v26 = vld [vmem:[%s1336_s30 + $0x48] sm:$0xff]  ;;  %v264_v29 = vpack.c.bf16 %v236_v22, %v235_v21 }
  0x14   : > { %v253_v27 = vld [vmem:[%s1336_s30 + $0xc0] sm:$0xff]  ;;  %v254_v28 = vld [vmem:[%s1336_s30 + $0xc8] sm:$0xff]  ;;  %v272_v30 = vpack.c.bf16 %v252_v24, %v251_v23  ;;  %v265_v31 = vpack.c.bf16 %v238_v26, %v237_v25  ;;  %v239_v33 = vld [vmem:[%s1336_s30 + $0x50] sm:$0xff] }
  0x15   : > { %1159 = vmatpush3.bf16.msra.mxu0 %v1208_v2  ;;  %1197 = vmatpush3.bf16.msra.mxu1 %v1208_v2  ;;  %v273_v32 = vpack.c.bf16 %v254_v28, %v253_v27  ;;  %v240_v34 = vld [vmem:[%s1336_s30 + $0x58] sm:$0xff]  ;;  %v255_v35 = vld [vmem:[%s1336_s30 + $0xd0] sm:$0xff]  ;;  %v241_v37 = vld [vmem:[%s1336_s30 + $0x60] sm:$0xff] }
  0x16   : > { %v256_v36 = vld [vmem:[%s1336_s30 + $0xd8] sm:$0xff]  ;;  %v242_v38 = vld [vmem:[%s1336_s30 + $0x68] sm:$0xff]  ;;  %v257_v39 = vld [vmem:[%s1336_s30 + $0xe0] sm:$0xff]  ;;  %v266_v41 = vpack.c.bf16 %v240_v34, %v239_v33 }
  0x17   : > { %v258_v40 = vld [vmem:[%s1336_s30 + $0xe8] sm:$0xff]  ;;  %v274_v42 = vpack.c.bf16 %v256_v36, %v255_v35  ;;  %v267_v43 = vpack.c.bf16 %v242_v38, %v241_v37  ;;  %v243_v45 = vld [vmem:[%s1336_s30 + $0x70] sm:$0xff]  ;;  %v244_v46 = vld [vmem:[%s1336_s30 + $0x78] sm:$0xff] }
  0x18   : > { %1161 = vmatmul.mubr.msk.bf16.vlgmr.msra.gmra.mxu0 %vm308_vm0, %v262_v14  ;;  %1177 = vmatmul.mubr.msk.bf16.vlgmr.msra.gmra.mxu1 %vm308_vm0, %v270_v15  ;;  %v275_v44 = vpack.c.bf16 %v258_v40, %v257_v39  ;;  %v259_v47 = vld [vmem:[%s1336_s30 + $0xf0] sm:$0xff]  ;;  %v260_v48 = vld [vmem:[%s1336_s30 + $0xf8] sm:$0xff]  ;;  %v268_v49 = vpack.c.bf16 %v244_v46, %v243_v45 }
  0x19   : > { %1164 = vmatprep.mubr.msk.bf16.mxu0 %vm308_vm0, %v263_v17  ;;  %1180 = vmatprep.mubr.msk.bf16.mxu1 %vm308_vm0, %v271_v20  ;;  %v276_v50 = vpack.c.bf16 %v260_v48, %v259_v47 }
  0x20   : > { %1165 = vmatmul.mubr.msk.bf16.gmra.mxu0 %vm308_vm0, %v264_v29  ;;  %1181 = vmatmul.mubr.msk.bf16.gmra.mxu1 %vm308_vm0, %v272_v30 }
  0x21   : > { %1168 = vmatprep.mubr.msk.bf16.mxu0 %vm308_vm0, %v265_v31  ;;  %1184 = vmatprep.mubr.msk.bf16.mxu1 %vm308_vm0, %v273_v32 }
  0x28   : > { %1169 = vmatmul.mubr.msk.bf16.gmra.mxu0 %vm308_vm0, %v266_v41  ;;  %1185 = vmatmul.mubr.msk.bf16.gmra.mxu1 %vm308_vm0, %v274_v42 }
  0x29   : > { %1172 = vmatprep.mubr.msk.bf16.mxu0 %vm308_vm0, %v267_v43  ;;  %1188 = vmatprep.mubr.msk.bf16.mxu1 %vm308_vm0, %v275_v44 }
  0x30   : > { %1173 = vmatmul.mubr.msk.bf16.gmra.mxu0 %vm308_vm0, %v268_v49  ;;  %1189 = vmatmul.mubr.msk.bf16.gmra.mxu1 %vm308_vm0, %v276_v50 }
  0xd8   : > { %v1162_v52 = vpop.f32.mrf.mxu0  ;;  %v1178_v53 = vpop.f32.mrf.mxu1 }
  0xd9   : > { %v1392_v54 = vadd.f32 %v1162_v52, %v1389_v51  ;;  %v1395_v55 = vadd.f32 %v1178_v53, %v1389_v51 }
  0xda   : > { %v391_v56 = vpop.f32.mrf.mxu0  ;;  %v455_v57 = vpop.f32.mrf.mxu1 }
  0xdb   : > { %v1398_v58 = vadd.f32 %v1389_v51, %v391_v56  ;;  %v575_v59 = vsel %vm520_vm1, %v1395_v55, 0.0  ;;  %v527_v60 = vsel %vm520_vm1, %v1392_v54, 0.0  ;;  %v1408_v2 = vadd.f32 %v1389_v51, %v455_v57 }
  0xdc   : > { %576 = vadd.xlane.f32.xlu0 %v575_v59  ;;  %v1179_v61 = vpop.f32.mrf.mxu1  ;;  %528 = vadd.xlane.f32.xlu1 %v527_v60  ;;  %v1163_v62 = vpop.f32.mrf.mxu0 }
  0xdd   : > { %v1405_v63 = vadd.f32 %v1163_v62, %v1389_v51  ;;  %v1411_v3 = vadd.f32 %v1179_v61, %v1389_v51  ;;  %v521_v5 = vsel %vm520_vm1, %v1398_v58, 0.0  ;;  %v569_v12 = vsel %vm520_vm1, %v1408_v2, 0.0 }
  0xde   : > { %v394_v0 = vpop.f32.mrf.mxu0  ;;  %v458_v1 = vpop.f32.mrf.mxu1 }
  0xdf   : > { %v530_v4 = vsel %vm520_vm1, %v1405_v63, 0.0  ;;  %v1418_v9 = vadd.f32 %v1389_v51, %v394_v0  ;;  %v1421_v10 = vadd.f32 %v1389_v51, %v458_v1  ;;  %v578_v11 = vsel %vm520_vm1, %v1411_v3, 0.0 }
  0xe0   : > { %531 = vadd.xlane.f32.xlu1 %v530_v4  ;;  %522 = vadd.xlane.f32.xlu0 %v521_v5  ;;  %v1166_v6 = vpop.f32.mrf.mxu0  ;;  %v1182_v7 = vpop.f32.mrf.mxu1 }
  0xe1   : > { %v1428_v15 = vadd.f32 %v1166_v6, %v1389_v51  ;;  %v572_v17 = vsel %vm520_vm1, %v1421_v10, 0.0  ;;  %v524_v18 = vsel %vm520_vm1, %v1418_v9, 0.0  ;;  %v1438_v20 = vadd.f32 %v1182_v7, %v1389_v51 }
  0xe2   : > { %v407_v8 = vpop.f32.mrf.mxu0  ;;  %v471_v14 = vpop.f32.mrf.mxu1 }
  0xe3   : > { %v539_v23 = vsel %vm520_vm1, %v1428_v15, 0.0  ;;  %v587_v27 = vsel %vm520_vm1, %v1438_v20, 0.0  ;;  %v1452_v29 = vadd.f32 %v1389_v51, %v407_v8  ;;  %v1458_v33 = vadd.f32 %v1389_v51, %v471_v14 }
  0xe4   : > { %579 = vadd.xlane.f32.xlu1 %v578_v11  ;;  %570 = vadd.xlane.f32.xlu0 %v569_v12  ;;  %v1167_v13 = vpop.f32.mrf.mxu0  ;;  %v1183_v19 = vpop.f32.mrf.mxu1 }
  0xe5   : > { %v1431_v16 = vadd.f32 %v1167_v13, %v1389_v51  ;;  %v1441_v21 = vadd.f32 %v1183_v19, %v1389_v51  ;;  %v533_v36 = vsel %vm520_vm1, %v1452_v29, 0.0  ;;  %v581_v42 = vsel %vm520_vm1, %v1458_v33, 0.0 }
  0xe6   : > { %v410_v24 = vpop.f32.mrf.mxu0  ;;  %v474_v28 = vpop.f32.mrf.mxu1 }
  0xe7   : > { %v542_v22 = vsel %vm520_vm1, %v1431_v16, 0.0  ;;  %v590_v26 = vsel %vm520_vm1, %v1441_v21, 0.0  ;;  %v1455_v30 = vadd.f32 %v1389_v51, %v410_v24  ;;  %v1461_v34 = vadd.f32 %v1389_v51, %v474_v28 }
  0xe8   : > { %573 = vadd.xlane.f32.xlu1 %v572_v17  ;;  %525 = vadd.xlane.f32.xlu0 %v524_v18  ;;  %v1170_v25 = vpop.f32.mrf.mxu0  ;;  %v1186_v32 = vpop.f32.mrf.mxu1 }
  0xe9   : > { %v536_v35 = vsel %vm520_vm1, %v1455_v30, 0.0  ;;  %v1468_v39 = vadd.f32 %v1170_v25, %v1389_v51  ;;  %v584_v41 = vsel %vm520_vm1, %v1461_v34, 0.0  ;;  %v1478_v44 = vadd.f32 %v1186_v32, %v1389_v51 }
  0xea   : > { %v423_v31 = vpop.f32.mrf.mxu0  ;;  %v487_v38 = vpop.f32.mrf.mxu1 }
  0xeb   : > { %v551_v47 = vsel %vm520_vm1, %v1468_v39, 0.0  ;;  %v599_v52 = vsel %vm520_vm1, %v1478_v44, 0.0  ;;  %v1492_v56 = vadd.f32 %v1389_v51, %v423_v31  ;;  %v1498_v61 = vadd.f32 %v1389_v51, %v487_v38 }
  0xec   : > { %543 = vadd.xlane.f32.xlu1 %v542_v22  ;;  %540 = vadd.xlane.f32.xlu0 %v539_v23  ;;  %v1171_v37 = vpop.f32.mrf.mxu0  ;;  %v1187_v43 = vpop.f32.mrf.mxu1 }
  0xed   : > { %v1471_v40 = vadd.f32 %v1171_v37, %v1389_v51  ;;  %v1481_v45 = vadd.f32 %v1187_v43, %v1389_v51  ;;  %v545_v1 = vsel %vm520_vm1, %v1492_v56, 0.0  ;;  %v593_v11 = vsel %vm520_vm1, %v1498_v61, 0.0 }
  0xee   : > { %v426_v48 = vpop.f32.mrf.mxu0  ;;  %v490_v53 = vpop.f32.mrf.mxu1 }
  0xef   : > { %v554_v46 = vsel %vm520_vm1, %v1471_v40, 0.0  ;;  %v602_v50 = vsel %vm520_vm1, %v1481_v45, 0.0  ;;  %v1495_v57 = vadd.f32 %v1389_v51, %v426_v48  ;;  %v1501_v62 = vadd.f32 %v1389_v51, %v490_v53 }
  0xf0   : > { %591 = vadd.xlane.f32.xlu1 %v590_v26  ;;  %588 = vadd.xlane.f32.xlu0 %v587_v27  ;;  %v1174_v49 = vpop.f32.mrf.mxu0  ;;  %v1190_v60 = vpop.f32.mrf.mxu1 }
  0xf1   : > { %v548_v0 = vsel %vm520_vm1, %v1495_v57, 0.0  ;;  %v1508_v6 = vadd.f32 %v1174_v49, %v1389_v51  ;;  %v596_v8 = vsel %vm520_vm1, %v1501_v62, 0.0  ;;  %v1538_v27 = vadd.f32 %v1190_v60, %v1389_v51 }
  0xf2   : > { %v439_v59 = vpop.f32.mrf.mxu0  ;;  %v503_v5 = vpop.f32.mrf.mxu1 }
  0xf3   : > { %v563_v17 = vsel %vm520_vm1, %v1508_v6, 0.0  ;;  %v1522_v18 = vadd.f32 %v1389_v51, %v439_v59  ;;  %v1528_v23 = vadd.f32 %v1389_v51, %v503_v5 }
  0xf4   : > { %537 = vadd.xlane.f32.xlu1 %v536_v35  ;;  %534 = vadd.xlane.f32.xlu0 %v533_v36  ;;  %v1175_v4 = vpop.f32.mrf.mxu0  ;;  %v1191_v13 = vpop.f32.mrf.mxu1  ;;  %v611_v36 = vsel %vm520_vm1, %v1538_v27, 0.0 }
  0xf5   : > { %v1511_v7 = vadd.f32 %v1175_v4, %v1389_v51  ;;  %v557_v26 = vsel %vm520_vm1, %v1522_v18, 0.0  ;;  %v1541_v28 = vadd.f32 %v1191_v13, %v1389_v51  ;;  %v605_v32 = vsel %vm520_vm1, %v1528_v23, 0.0 }
  0xf6   : > { %v442_v12 = vpop.f32.mrf.mxu0  ;;  %v506_v22 = vpop.f32.mrf.mxu1 }
  0xf7   : > { %v566_v14 = vsel %vm520_vm1, %v1511_v7, 0.0  ;;  %v1525_v19 = vadd.f32 %v1389_v51, %v442_v12  ;;  %v1531_v24 = vadd.f32 %v1389_v51, %v506_v22  ;;  %v614_v35 = vsel %vm520_vm1, %v1541_v28, 0.0 }
  0xf8   : > { %585 = vadd.xlane.f32.xlu1 %v584_v41  ;;  %582 = vadd.xlane.f32.xlu0 %v581_v42 }
  0xf9   : > { %v560_v25 = vsel %vm520_vm1, %v1525_v19, 0.0  ;;  %v608_v31 = vsel %vm520_vm1, %v1531_v24, 0.0 }
  0xfc   : > { %555 = vadd.xlane.f32.xlu1 %v554_v46  ;;  %552 = vadd.xlane.f32.xlu0 %v551_v47 }
 0x100   : > { %603 = vadd.xlane.f32.xlu1 %v602_v50  ;;  %600 = vadd.xlane.f32.xlu0 %v599_v52 }
 0x104   : > { %549 = vadd.xlane.f32.xlu1 %v548_v0  ;;  %546 = vadd.xlane.f32.xlu0 %v545_v1 }
 0x108   : > { %597 = vadd.xlane.f32.xlu1 %v596_v8  ;;  %594 = vadd.xlane.f32.xlu0 %v593_v11 }
 0x10c   : > { %567 = vadd.xlane.f32.xlu1 %v566_v14  ;;  %564 = vadd.xlane.f32.xlu0 %v563_v17 }
 0x110   : > { %561 = vadd.xlane.f32.xlu1 %v560_v25  ;;  %558 = vadd.xlane.f32.xlu0 %v557_v26 }
 0x114   : > { %609 = vadd.xlane.f32.xlu1 %v608_v31  ;;  %606 = vadd.xlane.f32.xlu0 %v605_v32 }
 0x118   : > { %615 = vadd.xlane.f32.xlu1 %v614_v35  ;;  %612 = vadd.xlane.f32.xlu0 %v611_v36 }
 0x165   : > { %v577_v37 = vpop.xlane.xlu0 %576  ;;  %v529_v38 = vpop.xlane.xlu1 %528 }
 0x166   : > { %v636_v51 = vmul.f32 0.0625, %v577_v37  ;;  %v620_v41 = vmul.f32 0.0625, %v529_v38 }
 0x168   : > { %v1552_v42 = vsub.f32 %v1395_v55, %v636_v51  ;;  %v1555_v43 = vsub.f32 %v1392_v54, %v620_v41 }
 0x169   : > { %v532_v46 = vpop.xlane.xlu1 %531  ;;  %v523_v47 = vpop.xlane.xlu0 %522 }
 0x16a   : > { %v621_v48 = vmul.f32 0.0625, %v532_v46  ;;  %v618_v49 = vmul.f32 0.0625, %v523_v47  ;;  %v684_v50 = vmul.f32 %v1555_v43, %v1555_v43  ;;  %v700_v55 = vmul.f32 %v1552_v42, %v1552_v42 }
 0x16c   : > { %v1560_v52 = vsub.f32 %v1405_v63, %v621_v48  ;;  %v1563_v53 = vsub.f32 %v1398_v58, %v618_v49  ;;  %v720_v59 = vsel %vm520_vm1, %v684_v50, 0.0  ;;  %v768_v11 = vsel %vm520_vm1, %v700_v55, 0.0 }
 0x16d   : > { %v580_v54 = vpop.xlane.xlu1 %579  ;;  %721 = vadd.xlane.f32.xlu0 %v720_v59  ;;  %v571_v60 = vpop.xlane.xlu0 %570 }
 0x16e   : > { %v637_v0 = vmul.f32 0.0625, %v580_v54  ;;  %v634_v1 = vmul.f32 0.0625, %v571_v60  ;;  %v685_v4 = vmul.f32 %v1560_v52, %v1560_v52  ;;  %v682_v63 = vmul.f32 %v1563_v53, %v1563_v53 }
 0x170   : > { %v1573_v5 = vsub.f32 %v1411_v3, %v637_v0  ;;  %v1576_v58 = vsub.f32 %v1408_v2, %v634_v1  ;;  %v723_v8 = vsel %vm520_vm1, %v685_v4, 0.0  ;;  %v714_v25 = vsel %vm520_vm1, %v682_v63, 0.0 }
 0x171   : > { %v574_v12 = vpop.xlane.xlu1 %573  ;;  %724 = vadd.xlane.f32.xlu1 %v723_v8  ;;  %769 = vadd.xlane.f32.xlu0 %v768_v11  ;;  %v526_v13 = vpop.xlane.xlu0 %525 }
 0x172   : > { %v635_v14 = vmul.f32 0.0625, %v574_v12  ;;  %v619_v17 = vmul.f32 0.0625, %v526_v13  ;;  %v701_v22 = vmul.f32 %v1573_v5, %v1573_v5  ;;  %v698_v31 = vmul.f32 %v1576_v58, %v1576_v58 }
 0x174   : > { %v1584_v3 = vsub.f32 %v1421_v10, %v635_v14  ;;  %v1587_v2 = vsub.f32 %v1418_v9, %v619_v17  ;;  %v771_v26 = vsel %vm520_vm1, %v701_v22, 0.0  ;;  %v762_v41 = vsel %vm520_vm1, %v698_v31, 0.0 }
 0x175   : > { %v544_v32 = vpop.xlane.xlu1 %543  ;;  %772 = vadd.xlane.f32.xlu1 %v771_v26  ;;  %715 = vadd.xlane.f32.xlu0 %v714_v25  ;;  %v541_v35 = vpop.xlane.xlu0 %540 }
 0x176   : > { %v625_v36 = vmul.f32 0.0625, %v544_v32  ;;  %v624_v37 = vmul.f32 0.0625, %v541_v35  ;;  %v683_v38 = vmul.f32 %v1587_v2, %v1587_v2  ;;  %v699_v10 = vmul.f32 %v1584_v3, %v1584_v3 }
 0x178   : > { %v1597_v9 = vsub.f32 %v1431_v16, %v625_v36  ;;  %v1600_v51 = vsub.f32 %v1428_v15, %v624_v37  ;;  %v717_v46 = vsel %vm520_vm1, %v683_v38, 0.0  ;;  %v765_v55 = vsel %vm520_vm1, %v699_v10, 0.0 }
 0x179   : > { %v592_v47 = vpop.xlane.xlu1 %591  ;;  %763 = vadd.xlane.f32.xlu0 %v762_v41  ;;  %718 = vadd.xlane.f32.xlu1 %v717_v46  ;;  %v589_v48 = vpop.xlane.xlu0 %588 }
 0x17a   : > { %v641_v49 = vmul.f32 0.0625, %v592_v47  ;;  %v640_v50 = vmul.f32 0.0625, %v589_v48  ;;  %v688_v59 = vmul.f32 %v1600_v51, %v1600_v51  ;;  %v689_v60 = vmul.f32 %v1597_v9, %v1597_v9 }
 0x17c   : > { %v1608_v16 = vsub.f32 %v1441_v21, %v641_v49  ;;  %v1611_v15 = vsub.f32 %v1438_v20, %v640_v50  ;;  %v732_v54 = vsel %vm520_vm1, %v688_v59, 0.0  ;;  %v735_v12 = vsel %vm520_vm1, %v689_v60, 0.0 }
 0x17d   : > { %v538_v0 = vpop.xlane.xlu1 %537  ;;  %766 = vadd.xlane.f32.xlu1 %v765_v55  ;;  %733 = vadd.xlane.f32.xlu0 %v732_v54  ;;  %v535_v1 = vpop.xlane.xlu0 %534 }
 0x17e   : > { %v623_v4 = vmul.f32 0.0625, %v538_v0  ;;  %v622_v63 = vmul.f32 0.0625, %v535_v1  ;;  %v704_v8 = vmul.f32 %v1611_v15, %v1611_v15  ;;  %v705_v21 = vmul.f32 %v1608_v16, %v1608_v16 }
 0x180   : > { %v1621_v20 = vsub.f32 %v1455_v30, %v623_v4  ;;  %v1624_v11 = vsub.f32 %v1452_v29, %v622_v63  ;;  %v780_v13 = vsel %vm520_vm1, %v704_v8, 0.0  ;;  %v783_v31 = vsel %vm520_vm1, %v705_v21, 0.0 }
 0x181   : > { %v586_v14 = vpop.xlane.xlu1 %585  ;;  %736 = vadd.xlane.f32.xlu1 %v735_v12  ;;  %781 = vadd.xlane.f32.xlu0 %v780_v13  ;;  %v583_v17 = vpop.xlane.xlu0 %582 }
 0x182   : > { %v639_v22 = vmul.f32 0.0625, %v586_v14  ;;  %v638_v25 = vmul.f32 0.0625, %v583_v17  ;;  %v686_v26 = vmul.f32 %v1624_v11, %v1624_v11  ;;  %v687_v35 = vmul.f32 %v1621_v20, %v1621_v20 }
 0x184   : > { %v1632_v30 = vsub.f32 %v1461_v34, %v639_v22  ;;  %v1635_v29 = vsub.f32 %v1458_v33, %v638_v25  ;;  %v726_v32 = vsel %vm520_vm1, %v686_v26, 0.0  ;;  %v729_v47 = vsel %vm520_vm1, %v687_v35, 0.0 }
 0x185   : > { %v556_v36 = vpop.xlane.xlu1 %555  ;;  %784 = vadd.xlane.f32.xlu1 %v783_v31  ;;  %727 = vadd.xlane.f32.xlu0 %v726_v32  ;;  %v553_v37 = vpop.xlane.xlu0 %552 }
 0x186   : > { %v629_v38 = vmul.f32 0.0625, %v556_v36  ;;  %v628_v10 = vmul.f32 0.0625, %v553_v37  ;;  %v702_v41 = vmul.f32 %v1635_v29, %v1635_v29  ;;  %v703_v34 = vmul.f32 %v1632_v30, %v1632_v30 }
 0x188   : > { %v1645_v33 = vsub.f32 %v1471_v40, %v629_v38  ;;  %v1648_v46 = vsub.f32 %v1468_v39, %v628_v10  ;;  %v774_v48 = vsel %vm520_vm1, %v702_v41, 0.0  ;;  %v777_v60 = vsel %vm520_vm1, %v703_v34, 0.0 }
 0x189   : > { %v604_v49 = vpop.xlane.xlu1 %603  ;;  %730 = vadd.xlane.f32.xlu1 %v729_v47  ;;  %775 = vadd.xlane.f32.xlu0 %v774_v48  ;;  %v601_v50 = vpop.xlane.xlu0 %600 }
 0x18a   : > { %v645_v59 = vmul.f32 0.0625, %v604_v49  ;;  %v644_v55 = vmul.f32 0.0625, %v601_v50  ;;  %v692_v54 = vmul.f32 %v1648_v46, %v1648_v46  ;;  %v693_v1 = vmul.f32 %v1645_v33, %v1645_v33 }
 0x18c   : > { %v1656_v40 = vsub.f32 %v1481_v45, %v645_v59  ;;  %v1659_v39 = vsub.f32 %v1478_v44, %v644_v55  ;;  %v744_v0 = vsel %vm520_vm1, %v692_v54, 0.0  ;;  %v747_v14 = vsel %vm520_vm1, %v693_v1, 0.0 }
 0x18d   : > { %v550_v4 = vpop.xlane.xlu1 %549  ;;  %778 = vadd.xlane.f32.xlu1 %v777_v60  ;;  %745 = vadd.xlane.f32.xlu0 %v744_v0  ;;  %v547_v63 = vpop.xlane.xlu0 %546 }
 0x18e   : > { %v627_v8 = vmul.f32 0.0625, %v550_v4  ;;  %v626_v21 = vmul.f32 0.0625, %v547_v63  ;;  %v708_v12 = vmul.f32 %v1659_v39, %v1659_v39  ;;  %v709_v45 = vmul.f32 %v1656_v40, %v1656_v40 }
 0x190   : > { %v1669_v44 = vsub.f32 %v1495_v57, %v627_v8  ;;  %v1672_v13 = vsub.f32 %v1492_v56, %v626_v21  ;;  %v792_v17 = vsel %vm520_vm1, %v708_v12, 0.0  ;;  %v795_v35 = vsel %vm520_vm1, %v709_v45, 0.0 }
 0x191   : > { %v598_v22 = vpop.xlane.xlu1 %597  ;;  %748 = vadd.xlane.f32.xlu1 %v747_v14  ;;  %793 = vadd.xlane.f32.xlu0 %v792_v17  ;;  %v595_v25 = vpop.xlane.xlu0 %594 }
 0x192   : > { %v643_v26 = vmul.f32 0.0625, %v598_v22  ;;  %v642_v31 = vmul.f32 0.0625, %v595_v25  ;;  %v690_v32 = vmul.f32 %v1672_v13, %v1672_v13  ;;  %v691_v37 = vmul.f32 %v1669_v44, %v1669_v44 }
 0x194   : > { %v1680_v57 = vsub.f32 %v1501_v62, %v643_v26  ;;  %v1683_v56 = vsub.f32 %v1498_v61, %v642_v31  ;;  %v738_v36 = vsel %vm520_vm1, %v690_v32, 0.0  ;;  %v741_v49 = vsel %vm520_vm1, %v691_v37, 0.0 }
 0x195   : > { %v568_v38 = vpop.xlane.xlu1 %567  ;;  %796 = vadd.xlane.f32.xlu1 %v795_v35  ;;  %739 = vadd.xlane.f32.xlu0 %v738_v36  ;;  %v565_v10 = vpop.xlane.xlu0 %564 }
 0x196   : > { %v633_v41 = vmul.f32 0.0625, %v568_v38  ;;  %v632_v34 = vmul.f32 0.0625, %v565_v10  ;;  %v706_v47 = vmul.f32 %v1683_v56, %v1683_v56  ;;  %v707_v62 = vmul.f32 %v1680_v57, %v1680_v57 }
 0x198   : > { %v1693_v61 = vsub.f32 %v1511_v7, %v633_v41  ;;  %v1696_v48 = vsub.f32 %v1508_v6, %v632_v34  ;;  %v786_v50 = vsel %vm520_vm1, %v706_v47, 0.0  ;;  %v789_v1 = vsel %vm520_vm1, %v707_v62, 0.0 }
 0x199   : > { %v562_v59 = vpop.xlane.xlu1 %561  ;;  %742 = vadd.xlane.f32.xlu1 %v741_v49  ;;  %787 = vadd.xlane.f32.xlu0 %v786_v50  ;;  %v559_v55 = vpop.xlane.xlu0 %558 }
 0x19a   : > { %v631_v54 = vmul.f32 0.0625, %v562_v59  ;;  %v630_v60 = vmul.f32 0.0625, %v559_v55  ;;  %v696_v0 = vmul.f32 %v1696_v48, %v1696_v48  ;;  %v697_v63 = vmul.f32 %v1693_v61, %v1693_v61 }
 0x19c   : > { %v1704_v7 = vsub.f32 %v1525_v19, %v631_v54  ;;  %v1707_v6 = vsub.f32 %v1522_v18, %v630_v60  ;;  %v756_v4 = vsel %vm520_vm1, %v696_v0, 0.0  ;;  %v759_v22 = vsel %vm520_vm1, %v697_v63, 0.0 }
 0x19d   : > { %v610_v8 = vpop.xlane.xlu1 %609  ;;  %790 = vadd.xlane.f32.xlu1 %v789_v1  ;;  %757 = vadd.xlane.f32.xlu0 %v756_v4  ;;  %v607_v21 = vpop.xlane.xlu0 %606 }
 0x19e   : > { %v647_v12 = vmul.f32 0.0625, %v610_v8  ;;  %v646_v45 = vmul.f32 0.0625, %v607_v21  ;;  %v694_v14 = vmul.f32 %v1707_v6, %v1707_v6  ;;  %v695_v19 = vmul.f32 %v1704_v7, %v1704_v7 }
 0x1a0   : > { %v1717_v18 = vsub.f32 %v1531_v24, %v647_v12  ;;  %v1720_v17 = vsub.f32 %v1528_v23, %v646_v45  ;;  %v750_v25 = vsel %vm520_vm1, %v694_v14, 0.0  ;;  %v753_v37 = vsel %vm520_vm1, %v695_v19, 0.0 }
 0x1a1   : > { %v616_v26 = vpop.xlane.xlu1 %615  ;;  %760 = vadd.xlane.f32.xlu1 %v759_v22  ;;  %751 = vadd.xlane.f32.xlu0 %v750_v25  ;;  %v613_v31 = vpop.xlane.xlu0 %612 }
 0x1a2   : > { %v649_v32 = vmul.f32 0.0625, %v616_v26  ;;  %v648_v35 = vmul.f32 0.0625, %v613_v31  ;;  %v710_v36 = vmul.f32 %v1720_v17, %v1720_v17  ;;  %v711_v10 = vmul.f32 %v1717_v18, %v1717_v18 }
 0x1a4   : > { %v1728_v24 = vsub.f32 %v1541_v28, %v649_v32  ;;  %v1731_v23 = vsub.f32 %v1538_v27, %v648_v35  ;;  %v798_v38 = vsel %vm520_vm1, %v710_v36, 0.0  ;;  %v801_v34 = vsel %vm520_vm1, %v711_v10, 0.0  ;;  %v1746_v10 = vld [vmem:[%s1926_s3] ss:$0 sm:$0xff] }
 0x1a5   : > { %754 = vadd.xlane.f32.xlu1 %v753_v37  ;;  %799 = vadd.xlane.f32.xlu0 %v798_v38 }
 0x1a6   : > { %v712_v41 = vmul.f32 %v1731_v23, %v1731_v23  ;;  %v713_v28 = vmul.f32 %v1728_v24, %v1728_v24 }
 0x1a8   : > { %v804_v47 = vsel %vm520_vm1, %v712_v41, 0.0  ;;  %v807_v27 = vsel %vm520_vm1, %v713_v28, 0.0  ;;  %v1752_v28 = vld [vmem:[%s1927_s4] ss:$0 sm:$0xff] }
 0x1a9   : > { %802 = vadd.xlane.f32.xlu1 %v801_v34  ;;  %805 = vadd.xlane.f32.xlu0 %v804_v47 }
 0x1ad   : > { %808 = vadd.xlane.f32.xlu1 %v807_v27 }
 0x1f6   : > { %v722_v62 = vpop.xlane.xlu0 %721 }
 0x1f7   : > { %v812_v49 = vmul.f32 0.0625, %v722_v62 }
 0x1f9   : > { %v844_v50 = vadd.f32 1e-06, %v812_v49 }
 0x1fa   : > { %v725_v59 = vpop.xlane.xlu1 %724  ;;  %v770_v55 = vpop.xlane.xlu0 %769 }
 0x1fb   : > { %1209 = vrsqrt.f32 %v844_v50  ;;  %v813_v54 = vmul.f32 0.0625, %v725_v59  ;;  %v828_v60 = vmul.f32 0.0625, %v770_v55 }
 0x1fd   : > { %v845_v0 = vadd.f32 1e-06, %v813_v54  ;;  %v860_v1 = vadd.f32 1e-06, %v828_v60 }
 0x1fe   : > { %v773_v4 = vpop.xlane.xlu1 %772  ;;  %v716_v63 = vpop.xlane.xlu0 %715 }
 0x1ff   : > { %1211 = vrsqrt.f32 %v845_v0  ;;  %v829_v8 = vmul.f32 0.0625, %v773_v4  ;;  %v810_v21 = vmul.f32 0.0625, %v716_v63 }
 0x200   : > { %1213 = vrsqrt.f32 %v860_v1 }
 0x201   : > { %v861_v12 = vadd.f32 1e-06, %v829_v8  ;;  %v842_v45 = vadd.f32 1e-06, %v810_v21 }
 0x202   : > { %v719_v14 = vpop.xlane.xlu1 %718  ;;  %v764_v19 = vpop.xlane.xlu0 %763 }
 0x203   : > { %1215 = vrsqrt.f32 %v861_v12  ;;  %v811_v22 = vmul.f32 0.0625, %v719_v14  ;;  %v826_v25 = vmul.f32 0.0625, %v764_v19 }
 0x204   : > { %1217 = vrsqrt.f32 %v842_v45 }
 0x205   : > { %v843_v26 = vadd.f32 1e-06, %v811_v22  ;;  %v858_v31 = vadd.f32 1e-06, %v826_v25 }
 0x206   : > { %v767_v32 = vpop.xlane.xlu1 %766  ;;  %v734_v35 = vpop.xlane.xlu0 %733 }
 0x207   : > { %1219 = vrsqrt.f32 %v843_v26  ;;  %v827_v36 = vmul.f32 0.0625, %v767_v32  ;;  %v816_v37 = vmul.f32 0.0625, %v734_v35 }
 0x208   : > { %v1210_v38 = vpop.eup %1209  ;;  %1221 = vrsqrt.f32 %v858_v31 }
 0x209   : > { %v908_v41 = vmul.f32 %v1210_v38, %v1555_v43  ;;  %v859_v34 = vadd.f32 1e-06, %v827_v36  ;;  %v848_v47 = vadd.f32 1e-06, %v816_v37 }
 0x20a   : > { %v737_v27 = vpop.xlane.xlu1 %736  ;;  %v782_v62 = vpop.xlane.xlu0 %781 }
 0x20b   : > { %v946_v49 = vmul.f32 %v1746_v10, %v908_v41  ;;  %1223 = vrsqrt.f32 %v859_v34  ;;  %v817_v50 = vmul.f32 0.0625, %v737_v27  ;;  %v832_v59 = vmul.f32 0.0625, %v782_v62 }
 0x20c   : > { %v1212_v55 = vpop.eup %1211  ;;  %1225 = vrsqrt.f32 %v848_v47 }
 0x20d   : > { %v1214_v43 = vpop.eup %1213  ;;  %v984_v54 = vadd.f32 %v1752_v28, %v946_v49  ;;  %v909_v60 = vmul.f32 %v1212_v55, %v1560_v52  ;;  %v849_v0 = vadd.f32 1e-06, %v817_v50  ;;  %v864_v1 = vadd.f32 1e-06, %v832_v59 }
 0x20e   : > { %v924_v4 = vmul.f32 %v1214_v43, %v1552_v42  ;;  %v785_v63 = vpop.xlane.xlu1 %784  ;;  %v728_v8 = vpop.xlane.xlu0 %727 }
 0x20f   : > { %1016 = vst.msk [vmem:[%s1760_s14 + $0x10] sm:$0xff] %vm520_vm1, %v984_v54  ;;  %v947_v21 = vmul.f32 %v1746_v10, %v909_v60  ;;  %1227 = vrsqrt.f32 %v849_v0  ;;  %v833_v12 = vmul.f32 0.0625, %v785_v63  ;;  %v814_v45 = vmul.f32 0.0625, %v728_v8 }
 0x210   : > { %v1216_v14 = vpop.eup %1215  ;;  %v962_v19 = vmul.f32 %v1746_v10, %v924_v4  ;;  %1229 = vrsqrt.f32 %v864_v1 }
 0x211   : > { %v1218_v52 = vpop.eup %1217  ;;  %v985_v22 = vadd.f32 %v1752_v28, %v947_v21  ;;  %v925_v42 = vmul.f32 %v1216_v14, %v1573_v5  ;;  %v865_v25 = vadd.f32 1e-06, %v833_v12  ;;  %v846_v26 = vadd.f32 1e-06, %v814_v45 }
 0x212   : > { %v1000_v31 = vadd.f32 %v1752_v28, %v962_v19  ;;  %v906_v32 = vmul.f32 %v1218_v52, %v1563_v53  ;;  %v731_v35 = vpop.xlane.xlu1 %730  ;;  %v776_v36 = vpop.xlane.xlu0 %775 }
 0x213   : > { %1017 = vst.msk [vmem:[%s1760_s14 + $0x18] sm:$0xff] %vm520_vm1, %v985_v22  ;;  %v963_v37 = vmul.f32 %v1746_v10, %v925_v42  ;;  %1231 = vrsqrt.f32 %v865_v25  ;;  %v815_v38 = vmul.f32 0.0625, %v731_v35  ;;  %v830_v41 = vmul.f32 0.0625, %v776_v36 }
 0x214   : > { %v1220_v34 = vpop.eup %1219  ;;  %1032 = vst.msk [vmem:[%s1760_s14 + $0x90] sm:$0xff] %vm520_vm1, %v1000_v31  ;;  %v944_v5 = vmul.f32 %v1746_v10, %v906_v32  ;;  %1233 = vrsqrt.f32 %v846_v26 }
 0x215   : > { %v1222_v47 = vpop.eup %1221  ;;  %v1001_v53 = vadd.f32 %v1752_v28, %v963_v37  ;;  %v907_v27 = vmul.f32 %v1220_v34, %v1587_v2  ;;  %v847_v62 = vadd.f32 1e-06, %v815_v38  ;;  %v862_v49 = vadd.f32 1e-06, %v830_v41 }
 0x216   : > { %v982_v50 = vadd.f32 %v1752_v28, %v944_v5  ;;  %v922_v59 = vmul.f32 %v1222_v47, %v1576_v58  ;;  %v779_v55 = vpop.xlane.xlu1 %778  ;;  %v746_v43 = vpop.xlane.xlu0 %745 }
 0x217   : > { %1033 = vst.msk [vmem:[%s1760_s14 + $0x98] sm:$0xff] %vm520_vm1, %v1001_v53  ;;  %v945_v54 = vmul.f32 %v1746_v10, %v907_v27  ;;  %1235 = vrsqrt.f32 %v847_v62  ;;  %v831_v60 = vmul.f32 0.0625, %v779_v55  ;;  %v820_v0 = vmul.f32 0.0625, %v746_v43 }
 0x218   : > { %v1224_v1 = vpop.eup %1223  ;;  %1014 = vst.msk [vmem:[%s1760_s14] sm:$0xff] %vm520_vm1, %v982_v50  ;;  %v960_v2 = vmul.f32 %v1746_v10, %v922_v59  ;;  %1237 = vrsqrt.f32 %v862_v49 }
 0x219   : > { %v1226_v4 = vpop.eup %1225  ;;  %v983_v58 = vadd.f32 %v1752_v28, %v945_v54  ;;  %v923_v63 = vmul.f32 %v1224_v1, %v1584_v3  ;;  %v863_v8 = vadd.f32 1e-06, %v831_v60  ;;  %v852_v21 = vadd.f32 1e-06, %v820_v0 }
 0x21a   : > { %v998_v12 = vadd.f32 %v1752_v28, %v960_v2  ;;  %v912_v45 = vmul.f32 %v1226_v4, %v1600_v51  ;;  %v749_v14 = vpop.xlane.xlu1 %748  ;;  %v794_v19 = vpop.xlane.xlu0 %793 }
 0x21b   : > { %1015 = vst.msk [vmem:[%s1760_s14 + $0x8] sm:$0xff] %vm520_vm1, %v983_v58  ;;  %v961_v52 = vmul.f32 %v1746_v10, %v923_v63  ;;  %1239 = vrsqrt.f32 %v863_v8  ;;  %v821_v22 = vmul.f32 0.0625, %v749_v14  ;;  %v836_v42 = vmul.f32 0.0625, %v794_v19 }
 0x21c   : > { %v1228_v25 = vpop.eup %1227  ;;  %1030 = vst.msk [vmem:[%s1760_s14 + $0x80] sm:$0xff] %vm520_vm1, %v998_v12  ;;  %v950_v3 = vmul.f32 %v1746_v10, %v912_v45  ;;  %1241 = vrsqrt.f32 %v852_v21 }
 0x21d   : > { %v1230_v26 = vpop.eup %1229  ;;  %v999_v51 = vadd.f32 %v1752_v28, %v961_v52  ;;  %v913_v31 = vmul.f32 %v1228_v25, %v1597_v9  ;;  %v853_v32 = vadd.f32 1e-06, %v821_v22  ;;  %v868_v35 = vadd.f32 1e-06, %v836_v42 }
 0x21e   : > { %v988_v36 = vadd.f32 %v1752_v28, %v950_v3  ;;  %v928_v37 = vmul.f32 %v1230_v26, %v1611_v15  ;;  %v797_v38 = vpop.xlane.xlu1 %796  ;;  %v740_v41 = vpop.xlane.xlu0 %739 }
 0x21f   : > { %1031 = vst.msk [vmem:[%s1760_s14 + $0x88] sm:$0xff] %vm520_vm1, %v999_v51  ;;  %v951_v34 = vmul.f32 %v1746_v10, %v913_v31  ;;  %1243 = vrsqrt.f32 %v853_v32  ;;  %v837_v5 = vmul.f32 0.0625, %v797_v38  ;;  %v818_v47 = vmul.f32 0.0625, %v740_v41 }
 0x220   : > { %v1232_v53 = vpop.eup %1231  ;;  %1020 = vst.msk [vmem:[%s1760_s14 + $0x30] sm:$0xff] %vm520_vm1, %v988_v36  ;;  %v966_v9 = vmul.f32 %v1746_v10, %v928_v37  ;;  %1245 = vrsqrt.f32 %v868_v35 }
 0x221   : > { %v1234_v27 = vpop.eup %1233  ;;  %v989_v15 = vadd.f32 %v1752_v28, %v951_v34  ;;  %v929_v62 = vmul.f32 %v1232_v53, %v1608_v16  ;;  %v869_v49 = vadd.f32 1e-06, %v837_v5  ;;  %v850_v50 = vadd.f32 1e-06, %v818_v47 }
 0x222   : > { %v1004_v59 = vadd.f32 %v1752_v28, %v966_v9  ;;  %v910_v55 = vmul.f32 %v1234_v27, %v1624_v11  ;;  %v743_v43 = vpop.xlane.xlu1 %742  ;;  %v788_v54 = vpop.xlane.xlu0 %787 }
 0x223   : > { %1021 = vst.msk [vmem:[%s1760_s14 + $0x38] sm:$0xff] %vm520_vm1, %v989_v15  ;;  %v967_v60 = vmul.f32 %v1746_v10, %v929_v62  ;;  %1247 = vrsqrt.f32 %v869_v49  ;;  %v819_v0 = vmul.f32 0.0625, %v743_v43  ;;  %v834_v1 = vmul.f32 0.0625, %v788_v54 }
 0x224   : > { %v1236_v2 = vpop.eup %1235  ;;  %1036 = vst.msk [vmem:[%s1760_s14 + $0xb0] sm:$0xff] %vm520_vm1, %v1004_v59  ;;  %v948_v16 = vmul.f32 %v1746_v10, %v910_v55  ;;  %1249 = vrsqrt.f32 %v850_v50 }
 0x225   : > { %v1238_v4 = vpop.eup %1237  ;;  %v1005_v11 = vadd.f32 %v1752_v28, %v967_v60  ;;  %v911_v58 = vmul.f32 %v1236_v2, %v1621_v20  ;;  %v851_v63 = vadd.f32 1e-06, %v819_v0  ;;  %v866_v8 = vadd.f32 1e-06, %v834_v1 }
 0x226   : > { %v986_v21 = vadd.f32 %v1752_v28, %v948_v16  ;;  %v926_v12 = vmul.f32 %v1238_v4, %v1635_v29  ;;  %v791_v45 = vpop.xlane.xlu1 %790  ;;  %v758_v14 = vpop.xlane.xlu0 %757 }
 0x227   : > { %1037 = vst.msk [vmem:[%s1760_s14 + $0xb8] sm:$0xff] %vm520_vm1, %v1005_v11  ;;  %v949_v19 = vmul.f32 %v1746_v10, %v911_v58  ;;  %1251 = vrsqrt.f32 %v851_v63  ;;  %v835_v52 = vmul.f32 0.0625, %v791_v45  ;;  %v824_v22 = vmul.f32 0.0625, %v758_v14 }
 0x228   : > { %v1240_v42 = vpop.eup %1239  ;;  %1018 = vst.msk [vmem:[%s1760_s14 + $0x20] sm:$0xff] %vm520_vm1, %v986_v21  ;;  %v964_v20 = vmul.f32 %v1746_v10, %v926_v12  ;;  %1253 = vrsqrt.f32 %v866_v8 }
 0x229   : > { %v1242_v25 = vpop.eup %1241  ;;  %v987_v29 = vadd.f32 %v1752_v28, %v949_v19  ;;  %v927_v3 = vmul.f32 %v1240_v42, %v1632_v30  ;;  %v867_v26 = vadd.f32 1e-06, %v835_v52  ;;  %v856_v51 = vadd.f32 1e-06, %v824_v22 }
 0x22a   : > { %v1002_v31 = vadd.f32 %v1752_v28, %v964_v20  ;;  %v916_v32 = vmul.f32 %v1242_v25, %v1648_v46  ;;  %v761_v35 = vpop.xlane.xlu1 %760  ;;  %v752_v36 = vpop.xlane.xlu0 %751 }
 0x22b   : > { %1019 = vst.msk [vmem:[%s1760_s14 + $0x28] sm:$0xff] %vm520_vm1, %v987_v29  ;;  %v965_v37 = vmul.f32 %v1746_v10, %v927_v3  ;;  %1255 = vrsqrt.f32 %v867_v26  ;;  %v825_v38 = vmul.f32 0.0625, %v761_v35  ;;  %v822_v41 = vmul.f32 0.0625, %v752_v36 }
 0x22c   : > { %v1244_v34 = vpop.eup %1243  ;;  %1034 = vst.msk [vmem:[%s1760_s14 + $0xa0] sm:$0xff] %vm520_vm1, %v1002_v31  ;;  %v954_v30 = vmul.f32 %v1746_v10, %v916_v32  ;;  %1257 = vrsqrt.f32 %v856_v51 }
 0x22d   : > { %v1246_v5 = vpop.eup %1245  ;;  %v1003_v46 = vadd.f32 %v1752_v28, %v965_v37  ;;  %v917_v47 = vmul.f32 %v1244_v34, %v1645_v33  ;;  %v857_v53 = vadd.f32 1e-06, %v825_v38  ;;  %v854_v9 = vadd.f32 1e-06, %v822_v41 }
 0x22e   : > { %v992_v27 = vadd.f32 %v1752_v28, %v954_v30  ;;  %v932_v15 = vmul.f32 %v1246_v5, %v1659_v39  ;;  %v755_v62 = vpop.xlane.xlu1 %754  ;;  %v800_v49 = vpop.xlane.xlu0 %799 }
 0x22f   : > { %1035 = vst.msk [vmem:[%s1760_s14 + $0xa8] sm:$0xff] %vm520_vm1, %v1003_v46  ;;  %v955_v50 = vmul.f32 %v1746_v10, %v917_v47  ;;  %1259 = vrsqrt.f32 %v857_v53  ;;  %v823_v59 = vmul.f32 0.0625, %v755_v62  ;;  %v838_v55 = vmul.f32 0.0625, %v800_v49 }
 0x230   : > { %v1248_v43 = vpop.eup %1247  ;;  %1024 = vst.msk [vmem:[%s1760_s14 + $0x50] sm:$0xff] %vm520_vm1, %v992_v27  ;;  %v970_v33 = vmul.f32 %v1746_v10, %v932_v15  ;;  %1261 = vrsqrt.f32 %v854_v9 }
 0x231   : > { %v1250_v54 = vpop.eup %1249  ;;  %v993_v39 = vadd.f32 %v1752_v28, %v955_v50  ;;  %v933_v60 = vmul.f32 %v1248_v43, %v1656_v40  ;;  %v855_v0 = vadd.f32 1e-06, %v823_v59  ;;  %v870_v1 = vadd.f32 1e-06, %v838_v55 }
 0x232   : > { %v1008_v2 = vadd.f32 %v1752_v28, %v970_v33  ;;  %v914_v16 = vmul.f32 %v1250_v54, %v1672_v13  ;;  %v803_v4 = vpop.xlane.xlu1 %802  ;;  %v806_v11 = vpop.xlane.xlu0 %805 }
 0x233   : > { %1025 = vst.msk [vmem:[%s1760_s14 + $0x58] sm:$0xff] %vm520_vm1, %v993_v39  ;;  %v971_v58 = vmul.f32 %v1746_v10, %v933_v60  ;;  %1263 = vrsqrt.f32 %v855_v0  ;;  %v839_v63 = vmul.f32 0.0625, %v803_v4  ;;  %v840_v8 = vmul.f32 0.0625, %v806_v11 }
 0x234   : > { %v1252_v21 = vpop.eup %1251  ;;  %1040 = vst.msk [vmem:[%s1760_s14 + $0xd0] sm:$0xff] %vm520_vm1, %v1008_v2  ;;  %v952_v40 = vmul.f32 %v1746_v10, %v914_v16  ;;  %1265 = vrsqrt.f32 %v870_v1 }
 0x235   : > { %v1254_v12 = vpop.eup %1253  ;;  %v1009_v13 = vadd.f32 %v1752_v28, %v971_v58  ;;  %v915_v45 = vmul.f32 %v1252_v21, %v1669_v44  ;;  %v871_v14 = vadd.f32 1e-06, %v839_v63  ;;  %v872_v19 = vadd.f32 1e-06, %v840_v8 }
 0x236   : > { %v990_v52 = vadd.f32 %v1752_v28, %v952_v40  ;;  %v930_v22 = vmul.f32 %v1254_v12, %v1683_v56  ;;  %v809_v42 = vpop.xlane.xlu1 %808 }
 0x237   : > { %1041 = vst.msk [vmem:[%s1760_s14 + $0xd8] sm:$0xff] %vm520_vm1, %v1009_v13  ;;  %v953_v20 = vmul.f32 %v1746_v10, %v915_v45  ;;  %1267 = vrsqrt.f32 %v871_v14  ;;  %v841_v25 = vmul.f32 0.0625, %v809_v42 }
 0x238   : > { %v1256_v29 = vpop.eup %1255  ;;  %1022 = vst.msk [vmem:[%s1760_s14 + $0x40] sm:$0xff] %vm520_vm1, %v990_v52  ;;  %v968_v44 = vmul.f32 %v1746_v10, %v930_v22  ;;  %1269 = vrsqrt.f32 %v872_v19 }
 0x239   : > { %v1258_v3 = vpop.eup %1257  ;;  %v991_v26 = vadd.f32 %v1752_v28, %v953_v20  ;;  %v931_v56 = vmul.f32 %v1256_v29, %v1680_v57  ;;  %v873_v51 = vadd.f32 1e-06, %v841_v25 }
 0x23a   : > { %v1006_v31 = vadd.f32 %v1752_v28, %v968_v44  ;;  %v920_v32 = vmul.f32 %v1258_v3, %v1696_v48 }
 0x23b   : > { %1023 = vst.msk [vmem:[%s1760_s14 + $0x48] sm:$0xff] %vm520_vm1, %v991_v26  ;;  %v969_v35 = vmul.f32 %v1746_v10, %v931_v56  ;;  %1271 = vrsqrt.f32 %v873_v51 }
 0x23c   : > { %v1260_v36 = vpop.eup %1259  ;;  %1038 = vst.msk [vmem:[%s1760_s14 + $0xc0] sm:$0xff] %vm520_vm1, %v1006_v31  ;;  %v958_v37 = vmul.f32 %v1746_v10, %v920_v32 }
 0x23d   : > { %v1262_v38 = vpop.eup %1261  ;;  %v1007_v57 = vadd.f32 %v1752_v28, %v969_v35  ;;  %v921_v41 = vmul.f32 %v1260_v36, %v1693_v61 }
 0x23e   : > { %v996_v34 = vadd.f32 %v1752_v28, %v958_v37  ;;  %v918_v48 = vmul.f32 %v1262_v38, %v1707_v6 }
 0x23f   : > { %1039 = vst.msk [vmem:[%s1760_s14 + $0xc8] sm:$0xff] %vm520_vm1, %v1007_v57  ;;  %v959_v30 = vmul.f32 %v1746_v10, %v921_v41 }
 0x240   : > { %v1264_v5 = vpop.eup %1263  ;;  %1028 = vst.msk [vmem:[%s1760_s14 + $0x70] sm:$0xff] %vm520_vm1, %v996_v34  ;;  %v956_v46 = vmul.f32 %v1746_v10, %v918_v48 }
 0x241   : > { %v1266_v47 = vpop.eup %1265  ;;  %v997_v53 = vadd.f32 %v1752_v28, %v959_v30  ;;  %v919_v61 = vmul.f32 %v1264_v5, %v1704_v7 }
 0x242   : > { %v994_v9 = vadd.f32 %v1752_v28, %v956_v46  ;;  %v934_v6 = vmul.f32 %v1266_v47, %v1720_v17 }
 0x243   : > { %1029 = vst.msk [vmem:[%s1760_s14 + $0x78] sm:$0xff] %vm520_vm1, %v997_v53  ;;  %v957_v27 = vmul.f32 %v1746_v10, %v919_v61 }
 0x244   : > { %v1268_v15 = vpop.eup %1267  ;;  %1026 = vst.msk [vmem:[%s1760_s14 + $0x60] sm:$0xff] %vm520_vm1, %v994_v9  ;;  %v972_v62 = vmul.f32 %v1746_v10, %v934_v6 }
 0x245   : > { %v1270_v49 = vpop.eup %1269  ;;  %v995_v50 = vadd.f32 %v1752_v28, %v957_v27  ;;  %v935_v7 = vmul.f32 %v1268_v15, %v1717_v18 }
 0x246   : > { %v1010_v59 = vadd.f32 %v1752_v28, %v972_v62  ;;  %v936_v17 = vmul.f32 %v1270_v49, %v1731_v23 }
 0x247   : > { %1027 = vst.msk [vmem:[%s1760_s14 + $0x68] sm:$0xff] %vm520_vm1, %v995_v50  ;;  %v973_v55 = vmul.f32 %v1746_v10, %v935_v7 }
 0x248   : > { %v1272_v43 = vpop.eup %1271  ;;  %1042 = vst.msk [vmem:[%s1760_s14 + $0xe0] sm:$0xff] %vm520_vm1, %v1010_v59  ;;  %v974_v33 = vmul.f32 %v1746_v10, %v936_v17 }
 0x249   : > { %v1011_v54 = vadd.f32 %v1752_v28, %v973_v55  ;;  %v937_v39 = vmul.f32 %v1272_v43, %v1728_v24 }
 0x24a   : > { %v1012_v60 = vadd.f32 %v1752_v28, %v974_v33 }
 0x24b   : > { %1043 = vst.msk [vmem:[%s1760_s14 + $0xe8] sm:$0xff] %vm520_vm1, %v1011_v54  ;;  %v975_v18 = vmul.f32 %v1746_v10, %v937_v39 }
 0x24c   : > { %1044 = vst.msk [vmem:[%s1760_s14 + $0xf0] sm:$0xff] %vm520_vm1, %v1012_v60 }
 0x24d   : > { %v1013_v23 = vadd.f32 %v1752_v28, %v975_v18 }
 0x24f   : > { %1045 = vst.msk [vmem:[%s1760_s14 + $0xf8] sm:$0xff] %vm520_vm1, %v1013_v23 }
 0x250 PF: > { %s15_s18 = sadd.s32 1, %s1279_s18  }
 0x251   : > { %p12_p4 = scmp.ge.s32.totalorder %s15_s18, 10  }
 0x253   :  { %14 = sbr.rel (!%p12_p4) target bundleno = 1 (0x1), region = 70 }

</bundles_post_ra>
